<compile_context>
chip_gen: v7x
topology: tpu7x:2x2x1
jax: 0.10.0
libtpu: 0.0.40
codegen_flags: <defaults>
</compile_context>

<pallas_src>
import jax
import jax.numpy as jnp
from jax.experimental import pallas as pl
from jax.experimental.pallas import tpu as pltpu

NUM_STATE = 5      # input feature dim  (torch: nn.Linear(5, 100))
HIDDEN = 100       # hidden dim         (torch: nn.Linear(100, 1))
H_PAD = 128        # hidden dim padded to a full lane tile
TB_CAP = 4096      # max batch rows per grid step (VMEM-safe on all gens)


def _round_up(x, m):
    return (x + m - 1) // m * m


def critic_kernel(x_ref, w1t_ref, b1_ref, w2t_ref, b2_ref, o_ref):
    # x: [TB, 5]   w1t: [5, H_PAD]   b1: [1, H_PAD]   w2t: [H_PAD, 1]
    # b2: (1,) scalar in SMEM        o: [TB, 1]
    # fc1 + ReLU (MXU, f32 accumulate): h = relu(x @ W1^T + b1)
    h = jnp.dot(x_ref[...], w1t_ref[...], preferred_element_type=jnp.float32)
    h = jnp.maximum(h + b1_ref[...], 0.0)                       # [TB, H_PAD]
    # state_value head: v = h @ W2^T + b2  (padded hidden cols are exactly 0)
    v = jnp.dot(h, w2t_ref[...], preferred_element_type=jnp.float32) + b2_ref[0]
    o_ref[...] = v.astype(o_ref.dtype)                          # [TB, 1]


def _pick_batch_tile(B):
    """Batch tile: large (amortize per-step overhead), even-ish tile count when
    the batch is big so both v7x TensorCores get work via the parallel axis."""
    if B <= 1024:
        return B                                 # single block == full array
    pairs = pl.cdiv(B, 2 * TB_CAP)               # aim for ~2*pairs tiles
    return min(TB_CAP, _round_up(pl.cdiv(B, 2 * pairs), 128))


@jax.jit
def critic_forward(x, w1, b1, w2, b2):
    """value = relu(x @ w1.T + b1) @ w2.T + b2   (PyTorch Critic.forward).

    x:  [B, NUM_STATE] f32
    w1: [HIDDEN, NUM_STATE], b1: [HIDDEN]   (PyTorch nn.Linear layout)
    w2: [1, HIDDEN],         b2: [1]
    returns value: [B, 1] f32
    """
    x = x.astype(jnp.float32)
    B = x.shape[0]
    TB = _pick_batch_tile(B)
    num_tiles = pl.cdiv(B, TB)

    # Weight-side layout plumbing only (tiny, once per call; x is untouched).
    w1t = jnp.zeros((NUM_STATE, H_PAD), jnp.float32).at[:, :HIDDEN].set(w1.T)
    b1p = jnp.zeros((1, H_PAD), jnp.float32).at[0, :HIDDEN].set(b1)
    w2t = jnp.zeros((H_PAD, 1), jnp.float32).at[:HIDDEN, 0].set(w2[0])
    b2p = b2.reshape(1).astype(jnp.float32)      # 1-D SMEM scalar

    cost = pl.CostEstimate(
        flops=2 * B * (NUM_STATE * H_PAD + H_PAD),
        transcendentals=0,
        bytes_accessed=4 * (B * NUM_STATE + B
                            + NUM_STATE * H_PAD + H_PAD + H_PAD + 1),
    )

    out = pl.pallas_call(
        critic_kernel,
        out_shape=jax.ShapeDtypeStruct((B, 1), jnp.float32),
        grid=(num_tiles,),
        in_specs=[
            pl.BlockSpec((TB, NUM_STATE), lambda i: (i, 0)),     # x batch tile
            pl.BlockSpec((NUM_STATE, H_PAD), lambda i: (0, 0)),  # W1^T resident
            pl.BlockSpec((1, H_PAD), lambda i: (0, 0)),          # b1 resident
            pl.BlockSpec((H_PAD, 1), lambda i: (0, 0)),          # W2^T resident
            pl.BlockSpec(memory_space=pltpu.MemorySpace.SMEM),   # b2 scalar
        ],
        out_specs=pl.BlockSpec((TB, 1), lambda i: (i, 0)),
        compiler_params=pltpu.CompilerParams(
            dimension_semantics=("parallel",),        # megacore / v7x 2-TC shard
            vmem_limit_bytes=32 * 1024 * 1024,        # headroom for TB=4096 tiles
        ),
        cost_estimate=cost,
    )(x, w1t, b1p, w2t, b2p)

    return out


def init_params(key):
    """nn.Linear default init (U(-1/sqrt(fan_in), +1/sqrt(fan_in))), torch layout."""
    k1, k2, k3, k4 = jax.random.split(key, 4)
    bound1 = 1.0 / jnp.sqrt(jnp.float32(NUM_STATE))
    bound2 = 1.0 / jnp.sqrt(jnp.float32(HIDDEN))
    w1 = jax.random.uniform(k1, (HIDDEN, NUM_STATE), jnp.float32, -bound1, bound1)
    b1 = jax.random.uniform(k2, (HIDDEN,), jnp.float32, -bound1, bound1)
    w2 = jax.random.uniform(k3, (1, HIDDEN), jnp.float32, -bound2, bound2)
    b2 = jax.random.uniform(k4, (1,), jnp.float32, -bound2, bound2)
    return w1, b1, w2, b2


if __name__ == "__main__":
    key = jax.random.PRNGKey(0)
    kx, kp = jax.random.split(key)
    batch = 8
    x = jax.random.normal(kx, (batch, NUM_STATE), jnp.float32)
    w1, b1, w2, b2 = init_params(kp)

    value = critic_forward(x, w1, b1, w2, b2)
    value = jax.block_until_ready(value)

    # Reference check in plain JAX (PyTorch semantics).
    ref = jnp.maximum(x @ w1.T + b1, 0.0) @ w2.T + b2
    assert value.shape == (batch, 1)
    assert jnp.allclose(value, ref, atol=1e-5, rtol=1e-5)

    print("KERNEL_OK")
</pallas_src>

<mosaic_0001>
module attributes {stable_mosaic.version = 11 : i64} {
  func.func @critic_kernel(%arg0: i32, %arg1: memref<8x5xf32, #tpu.memory_space<vmem>>, %arg2: memref<5x128xf32, #tpu.memory_space<vmem>>, %arg3: memref<1x128xf32, #tpu.memory_space<vmem>>, %arg4: memref<128x1xf32, #tpu.memory_space<vmem>>, %arg5: memref<1xf32, #tpu.memory_space<smem>>, %arg6: memref<8x1xf32, #tpu.memory_space<vmem>>) attributes {dimension_semantics = [#tpu.dimension_semantics<parallel>], iteration_bounds = array<i64: 1>, scalar_prefetch = 0 : i64, scratch_operands = 0 : i64, tpu.core_type = #tpu.core_type<tc>, window_params = [{transform_indices = @transform_0, window_bounds = array<i64: 8, 5>}, {pipeline_mode = #tpu.pipeline_mode<synchronous>, transform_indices = @transform_1, window_bounds = array<i64: 5, 128>}, {pipeline_mode = #tpu.pipeline_mode<synchronous>, transform_indices = @transform_2, window_bounds = array<i64: 1, 128>}, {pipeline_mode = #tpu.pipeline_mode<synchronous>, transform_indices = @transform_3, window_bounds = array<i64: 128, 1>}, {transform_indices = @transform_4, window_bounds = array<i64: 1>}, {transform_indices = @transform_5, window_bounds = array<i64: 8, 1>}]} {
    %c0 = arith.constant 0 : index
    %c0_0 = arith.constant 0 : index
    %0 = vector.load %arg1[%c0, %c0_0] : memref<8x5xf32, #tpu.memory_space<vmem>>, vector<8x5xf32>
    %c0_1 = arith.constant 0 : index
    %c0_2 = arith.constant 0 : index
    %1 = vector.load %arg2[%c0_1, %c0_2] : memref<5x128xf32, #tpu.memory_space<vmem>>, vector<5x128xf32>
    %cst = arith.constant dense<0.000000e+00> : vector<8x128xf32>
    %2 = tpu.matmul %0, %1, %cst {dimension_numbers = #tpu.dot_dimension_numbers<[1], [0], [0], [1], [0, 0, 1, 1], [], []>} : vector<8x5xf32>, vector<5x128xf32>, vector<8x128xf32> -> vector<8x128xf32>
    %c0_3 = arith.constant 0 : index
    %c0_4 = arith.constant 0 : index
    %3 = vector.load %arg3[%c0_3, %c0_4] : memref<1x128xf32, #tpu.memory_space<vmem>>, vector<1x128xf32>
    %4 = vector.broadcast %3 : vector<1x128xf32> to vector<8x128xf32>
    %5 = arith.addf %2, %4 : vector<8x128xf32>
    %cst_5 = arith.constant 0.000000e+00 : f32
    %6 = vector.broadcast %cst_5 : f32 to vector<8x128xf32>
    %7 = arith.maximumf %5, %6 : vector<8x128xf32>
    %c0_6 = arith.constant 0 : index
    %c0_7 = arith.constant 0 : index
    %8 = vector.load %arg4[%c0_6, %c0_7] : memref<128x1xf32, #tpu.memory_space<vmem>>, vector<128x1xf32>
    %cst_8 = arith.constant dense<0.000000e+00> : vector<8x1xf32>
    %9 = tpu.matmul %7, %8, %cst_8 {dimension_numbers = #tpu.dot_dimension_numbers<[1], [0], [0], [1], [0, 0, 1, 1], [], []>} : vector<8x128xf32>, vector<128x1xf32>, vector<8x1xf32> -> vector<8x1xf32>
    %c0_9 = arith.constant 0 : index
    %10 = memref.load %arg5[%c0_9] : memref<1xf32, #tpu.memory_space<smem>>
    %11 = vector.broadcast %10 : f32 to vector<8x1xf32>
    %12 = arith.addf %9, %11 : vector<8x1xf32>
    %c0_10 = arith.constant 0 : index
    %c0_11 = arith.constant 0 : index
    %13 = vector.load %arg6[%c0_10, %c0_11] : memref<8x1xf32, #tpu.memory_space<vmem>>, vector<8x1xf32>
    tpu.vector_store %arg6[%c0_10, %c0_11], %12 {strides = array<i32>} : memref<8x1xf32, #tpu.memory_space<vmem>>, vector<8x1xf32>,
    return
  }
  func.func @transform_0(%arg0: i32) -> (i32, i32) {
    %c0_i32 = arith.constant 0 : i32
    %c0_i32_0 = arith.constant 0 : i32
    return %arg0, %c0_i32 : i32, i32
  }
  func.func @transform_1(%arg0: i32) -> (i32, i32) {
    %c0_i32 = arith.constant 0 : i32
    %c0_i32_0 = arith.constant 0 : i32
    %c0_i32_1 = arith.constant 0 : i32
    return %c0_i32, %c0_i32_0 : i32, i32
  }
  func.func @transform_2(%arg0: i32) -> (i32, i32) {
    %c0_i32 = arith.constant 0 : i32
    %c0_i32_0 = arith.constant 0 : i32
    %c0_i32_1 = arith.constant 0 : i32
    return %c0_i32, %c0_i32_0 : i32, i32
  }
  func.func @transform_3(%arg0: i32) -> (i32, i32) {
    %c0_i32 = arith.constant 0 : i32
    %c0_i32_0 = arith.constant 0 : i32
    %c0_i32_1 = arith.constant 0 : i32
    return %c0_i32, %c0_i32_0 : i32, i32
  }
  func.func @transform_4(%arg0: i32) -> i32 {
    %c0_i32 = arith.constant 0 : i32
    %c0_i32_0 = arith.constant 0 : i32
    return %c0_i32 : i32
  }
  func.func @transform_5(%arg0: i32) -> (i32, i32) {
    %c0_i32 = arith.constant 0 : i32
    %c0_i32_0 = arith.constant 0 : i32
    return %arg0, %c0_i32 : i32, i32
  }
}

</mosaic_0001>

<bundles_post_ra>
// kernel: critic_forward.1
= control target key start
LH: loop header
LB: loop body
LE: loop exit
PB: predicated region body
PF: predicated region fallthrough
CT: control target
= control target key end

     0   :  { %vm34_vm0 = vcmask 1044480   ;;  %vm30_vm1 = vcmask 39936   ;;  %v292_v0 = vmov 0.0   ;;  %vm293_vm2 = vmmov 0   ;;  %s388_s1 = inlined_call_operand.vmem [shape: f32[5,128], index: 1, kind: input, shape index: {}]   ;;  %s389_s0 = inlined_call_operand.vmem [shape: f32[8,5], index: 0, kind: input, shape index: {}]   ;;  %s390_s3 = inlined_call_operand.vmem [shape: f32[128,1], index: 3, kind: input, shape index: {}]   ;;  %s391_s2 = inlined_call_operand.vmem [shape: f32[1,128], index: 2, kind: input, shape index: {}]   ;;  %s392_s4 = inlined_call_operand.<no memory space> [shape: f32[1], index: 4, kind: input, shape index: {}]   ;;  %s393_s5 = inlined_call_operand.vmem [shape: f32[8,1], index: 5, kind: output, shape index: {}]  }
   0x1   :  { %225 = vmatprep.subr.mxu0 %v292_v0  ;;  %v22_v1 = vld [vmem:[%s388_s1] sm:$0x1f]  ;;  %227 = vmatprep.mubr.msk.f32.mxu0 %vm293_vm2, %v292_v0  ;;  %v294_v4 = vmov 0.0|0.0   ;;  %v110_v5 = vld [vmem:[%s390_s3 + $0x8] sm:$0xff]  ;;  %v111_v6 = vld [vmem:[%s390_s3 + $0x10] sm:$0xff]  ;;  %v126_v33 = vstv %s392_s4  ;;  %vm197_vm3 = vcmask 7168  }
   0x2   :  { %v21_v2 = vld [vmem:[%s389_s0] sm:$0xff]  ;;  %226 = vmatpush3.msk.msra.mxu0 %vm34_vm0, %v22_v1  ;;  %265 = vmatprep.subr.bf16.mxu1 %v294_v4  ;;  %v112_v7 = vld [vmem:[%s390_s3 + $0x18] sm:$0xff]  ;;  %v114_v11 = vld [vmem:[%s390_s3 + $0x28] sm:$0xff] }
   0x3   :  { %v109_v3 = vld [vmem:[%s390_s3] sm:$0xff]  ;;  %228 = vmatmul.mubr.msk.f32.vlgmr.msra.gmra.mrb[0].mxu0 %vm30_vm1, %v21_v2  ;;  %262 = vmatprep.mubr.msk.f32.mxu1 %vm293_vm2, %v292_v0  ;;  %v269_v9 = vpack.c.bf16 %v112_v7, %v111_v6  ;;  %v115_v13 = vld [vmem:[%s390_s3 + $0x30] sm:$0xff]  ;;  %v116_v14 = vld [vmem:[%s390_s3 + $0x38] sm:$0xff] }
   0x4   :  { %v266_v8 = vpack.c.bf16 %v110_v5, %v109_v3  ;;  %v113_v10 = vld [vmem:[%s390_s3 + $0x20] sm:$0xff]  ;;  %v275_v15 = vpack.c.bf16 %v116_v14, %v115_v13  ;;  %v118_v17 = vld [vmem:[%s390_s3 + $0x48] sm:$0xff]  ;;  %v119_v19 = vld [vmem:[%s390_s3 + $0x50] sm:$0xff] }
   0x5   :  { %v272_v12 = vpack.c.bf16 %v114_v11, %v113_v10  ;;  %v117_v16 = vld [vmem:[%s390_s3 + $0x40] sm:$0xff]  ;;  %v120_v20 = vld [vmem:[%s390_s3 + $0x58] sm:$0xff]  ;;  %v122_v23 = vld [vmem:[%s390_s3 + $0x68] sm:$0xff] }
   0x6   :  { %267 = vmatpush3.bf16.msra.mxu1 %v266_v8  ;;  %v278_v18 = vpack.c.bf16 %v118_v17, %v117_v16  ;;  %v281_v21 = vpack.c.bf16 %v120_v20, %v119_v19  ;;  %v121_v22 = vld [vmem:[%s390_s3 + $0x60] sm:$0xff]  ;;  %v123_v25 = vld [vmem:[%s390_s3 + $0x70] sm:$0xff]  ;;  %v124_v26 = vld [vmem:[%s390_s3 + $0x78] sm:$0xff] }
   0x7   :  { %268 = vmatprep.subr.bf16.mxu1 %v294_v4  ;;  %v284_v24 = vpack.c.bf16 %v122_v23, %v121_v22  ;;  %v287_v27 = vpack.c.bf16 %v124_v26, %v123_v25  ;;  %v203_v28 = vld [vmem:[%s391_s2] ss:$0 sm:$0xff] }
   0xa   :  { %270 = vmatpush3.bf16.msra.mxu1 %v269_v9 }
   0xb   :  { %271 = vmatprep.subr.bf16.mxu1 %v294_v4 }
   0xe   :  { %273 = vmatpush3.bf16.msra.mxu1 %v272_v12 }
   0xf   :  { %274 = vmatprep.subr.bf16.mxu1 %v294_v4 }
  0x12   :  { %276 = vmatpush3.bf16.msra.mxu1 %v275_v15 }
  0x13   :  { %277 = vmatprep.subr.bf16.mxu1 %v294_v4 }
  0x16   :  { %279 = vmatpush3.bf16.msra.mxu1 %v278_v18 }
  0x17   :  { %280 = vmatprep.subr.bf16.mxu1 %v294_v4 }
  0x1a   :  { %282 = vmatpush3.bf16.msra.mxu1 %v281_v21 }
  0x1b   :  { %283 = vmatprep.subr.bf16.mxu1 %v294_v4 }
  0x1e   :  { %285 = vmatpush3.bf16.msra.mxu1 %v284_v24 }
  0x1f   :  { %286 = vmatprep.subr.bf16.mxu1 %v294_v4 }
  0x22   :  { %288 = vmatpush3.bf16.msra.mxu1 %v287_v27 }
  0xd6   :  { %v104_v29 = vpop.f32.mrb[0].mxu0 }
  0xd7   :  { %v105_v30 = vadd.f32 %v203_v28, %v104_v29  ;;  %v229_v31 = vpop.f32.mrb[1].mxu0 }
  0xd9   :  { %v108_v32 = vmax.f32 %v105_v30, 0.0 }
  0xdb   :  { %263 = vmatmul.mubr.f32.vlgmr.msra.gmra.mrb[0].mxu1 %v108_v32 }
 0x1ae   :  { %v193_v34 = vpop.f32.mrb[0].mxu1 }
 0x1af   :  { %v194_v35 = vadd.f32 %v193_v34, %v126_v33  ;;  %v264_v36 = vpop.f32.mrb[1].mxu1 }
 0x1b1   :  { %198 = vst.msk [vmem:[%s393_s5] sm:$0xff] %vm197_vm3, %v194_v35 }

</bundles_post_ra>
